<compile_context>
chip_gen: v7x
topology: tpu7x:2x2x1
jax: 0.10.0
libtpu: 0.0.40
codegen_flags: <defaults>
</compile_context>

<pallas_src>
import jax
import jax.numpy as jnp
from jax.experimental import pallas as pl
from jax.experimental.pallas import tpu as pltpu

_LANE = 128
_SUB = 16  # bf16 sublane pack


def _round_up(x, m):
    return (x + m - 1) // m * m


def _mlp_kernel(x_ref, w1_ref, b1_ref, w2_ref, b2_ref, w3_ref, b3_ref, o_ref):
    # In-kernel bf16 cast of the streamed x tile (free under the DMA).
    x = x_ref[...].astype(jnp.bfloat16)
    # fc1: bf16 MXU matmul with f32 accumulation, then f32 bias + ReLU.
    h1 = jnp.dot(x, w1_ref[...], preferred_element_type=jnp.float32)
    h1 = jnp.maximum(h1 + b1_ref[...], 0.0)
    # fc2
    h2 = jnp.dot(h1.astype(jnp.bfloat16), w2_ref[...],
                 preferred_element_type=jnp.float32)
    h2 = jnp.maximum(h2 + b2_ref[...], 0.0)
    # fc3 + Sigmoid (f32 math, lane-dense padded bf16 store).
    logits = jnp.dot(h2.astype(jnp.bfloat16), w3_ref[...],
                     preferred_element_type=jnp.float32)
    o_ref[...] = jax.nn.sigmoid(logits + b3_ref[...]).astype(o_ref.dtype)


def classifier_forward(x, params, *, block_batch=512):
    """x: [batch, input_size] float32; params: dict of f32 weights/biases."""
    w1, b1 = params["w1"], params["b1"]
    w2, b2 = params["w2"], params["b2"]
    w3, b3 = params["w3"], params["b3"]

    batch, in_dim = x.shape
    hid = w1.shape[1]
    h2d = w2.shape[1]
    out_dim = w3.shape[1]

    # Pad output feature axis to a full 128-lane tile (unmasked stores).
    out_pad = _round_up(out_dim, _LANE)
    w3p = jnp.zeros((h2d, out_pad), w3.dtype).at[:, :out_dim].set(w3)
    b3p = jnp.zeros((1, out_pad), b3.dtype).at[:, :out_dim].set(b3)

    # Batch tiling: multiple of 16 rows per grid step, capped so the grid has
    # at least 2 steps (v7x has 2 TensorCores sharding the parallel axis).
    tb = min(block_batch, max(_SUB, _round_up(pl.cdiv(batch, 2), _SUB)))
    tb = _round_up(tb, _SUB)

    # Only pad tiny batches (< one tile); large batches use pl.cdiv edge
    # handling instead of a full jnp.pad copy of x.
    batch_eff = batch
    if batch < tb:
        x = jnp.pad(x, ((0, tb - batch), (0, 0)))
        batch_eff = tb
    grid = (pl.cdiv(batch_eff, tb),)

    # Weights cast to bf16 outside (fetched once); x stays f32 to the call.
    w1_bf = w1.astype(jnp.bfloat16)
    w2_bf = w2.astype(jnp.bfloat16)
    w3_bf = w3p.astype(jnp.bfloat16)

    # Explicit VMEM budget. Every input is double-buffered by the pipeline,
    # including the constant-index "resident" weights/biases, so count 2x.
    vmem_bytes = (
        2 * tb * in_dim * 4                                    # x tiles (f32)
        + 2 * tb * out_pad * 2                                 # out tiles (bf16)
        + 2 * (in_dim * hid + hid * h2d + h2d * out_pad) * 2   # weights (bf16)
        + 2 * (hid + h2d + out_pad) * 4                        # biases (f32)
        + (4 << 20)                                            # slack
    )
    vmem_bytes = int(min(max(vmem_bytes, 8 << 20), 64 << 20))

    def resident(shape):
        # Whole array, constant index_map -> stays in VMEM across grid steps.
        return pl.BlockSpec(shape, lambda i: (0, 0))

    out = pl.pallas_call(
        _mlp_kernel,
        out_shape=jax.ShapeDtypeStruct((batch_eff, out_pad), jnp.bfloat16),
        grid=grid,
        in_specs=[
            pl.BlockSpec((tb, in_dim), lambda i: (i, 0)),  # x: streamed per step
            resident((in_dim, hid)),
            resident((1, hid)),
            resident((hid, h2d)),
            resident((1, h2d)),
            resident((h2d, out_pad)),
            resident((1, out_pad)),
        ],
        out_specs=pl.BlockSpec((tb, out_pad), lambda i: (i, 0)),
        compiler_params=pltpu.CompilerParams(
            dimension_semantics=("parallel",),
            vmem_limit_bytes=vmem_bytes,
        ),
    )(x, w1_bf, b1, w2_bf, b2, w3_bf, b3p)

    # Slice off padded rows/columns; cast the (batch, out_dim) result to f32.
    return out[:batch, :out_dim].astype(jnp.float32)


def init_params(key, input_size, hidden_size, output_size):
    """Deterministic init mimicking torch.nn.Linear's U(-1/sqrt(fan_in), ...)."""
    ks = jax.random.split(key, 6)
    h2 = hidden_size // 2

    def lin(kw, kb, fan_in, fan_out):
        bound = 1.0 / jnp.sqrt(float(fan_in))
        w = jax.random.uniform(kw, (fan_in, fan_out), jnp.float32, -bound, bound)
        b = jax.random.uniform(kb, (1, fan_out), jnp.float32, -bound, bound)
        return w, b

    w1, b1 = lin(ks[0], ks[1], input_size, hidden_size)
    w2, b2 = lin(ks[2], ks[3], hidden_size, h2)
    w3, b3 = lin(ks[4], ks[5], h2, output_size)
    return {"w1": w1, "b1": b1, "w2": w2, "b2": b2, "w3": w3, "b3": b3}


if __name__ == "__main__":
    # Small shapes consistent with the module's forward. batch=50 gives a
    # 2-step grid (tb=32) and exercises the non-divisible last block + the
    # padded-output-column slice path.
    batch, input_size, hidden_size, output_size = 50, 32, 32, 4

    key = jax.random.PRNGKey(0)
    k_x, k_p = jax.random.split(key)
    x = jax.random.normal(k_x, (batch, input_size), dtype=jnp.float32)
    params = init_params(k_p, input_size, hidden_size, output_size)

    out = classifier_forward(x, params)
    out = jax.block_until_ready(out)

    # Pure-JAX reference using the same bf16 weight/activation casts, f32
    # accumulation, and final bf16 store rounding (matches kernel numerics).
    def ref_bf16(x, p):
        xb = x.astype(jnp.bfloat16)
        h = jnp.dot(xb, p["w1"].astype(jnp.bfloat16),
                    preferred_element_type=jnp.float32) + p["b1"]
        h = jnp.maximum(h, 0.0)
        h = jnp.dot(h.astype(jnp.bfloat16), p["w2"].astype(jnp.bfloat16),
                    preferred_element_type=jnp.float32) + p["b2"]
        h = jnp.maximum(h, 0.0)
        logits = jnp.dot(h.astype(jnp.bfloat16), p["w3"].astype(jnp.bfloat16),
                         preferred_element_type=jnp.float32) + p["b3"]
        return jax.nn.sigmoid(logits).astype(jnp.bfloat16).astype(jnp.float32)

    expected = ref_bf16(x, params)
    assert out.shape == (batch, output_size)
    assert jnp.allclose(out, expected, atol=1e-2, rtol=1e-2), (
        float(jnp.max(jnp.abs(out - expected))))

    # Sanity check against the full-f32 reference (bf16 rounding tolerance).
    def ref_f32(x, p):
        h = jnp.maximum(x @ p["w1"] + p["b1"], 0.0)
        h = jnp.maximum(h @ p["w2"] + p["b2"], 0.0)
        return jax.nn.sigmoid(h @ p["w3"] + p["b3"])

    assert jnp.allclose(out, ref_f32(x, params), atol=5e-2, rtol=5e-2)

    print("KERNEL_OK")
</pallas_src>

<mosaic_0001>
module attributes {stable_mosaic.version = 11 : i64} {
  func.func @_mlp_kernel(%arg0: i32, %arg1: memref<32x32xf32, #tpu.memory_space<vmem>>, %arg2: memref<32x32xbf16, #tpu.memory_space<vmem>>, %arg3: memref<1x32xf32, #tpu.memory_space<vmem>>, %arg4: memref<32x16xbf16, #tpu.memory_space<vmem>>, %arg5: memref<1x16xf32, #tpu.memory_space<vmem>>, %arg6: memref<16x128xbf16, #tpu.memory_space<vmem>>, %arg7: memref<1x128xf32, #tpu.memory_space<vmem>>, %arg8: memref<32x128xbf16, #tpu.memory_space<vmem>>) attributes {dimension_semantics = [#tpu.dimension_semantics<parallel>], iteration_bounds = array<i64: 2>, scalar_prefetch = 0 : i64, scratch_operands = 0 : i64, tpu.core_type = #tpu.core_type<tc>, window_params = [{transform_indices = @transform_0, window_bounds = array<i64: 32, 32>}, {pipeline_mode = #tpu.pipeline_mode<synchronous>, transform_indices = @transform_1, window_bounds = array<i64: 32, 32>}, {pipeline_mode = #tpu.pipeline_mode<synchronous>, transform_indices = @transform_2, window_bounds = array<i64: 1, 32>}, {pipeline_mode = #tpu.pipeline_mode<synchronous>, transform_indices = @transform_3, window_bounds = array<i64: 32, 16>}, {pipeline_mode = #tpu.pipeline_mode<synchronous>, transform_indices = @transform_4, window_bounds = array<i64: 1, 16>}, {pipeline_mode = #tpu.pipeline_mode<synchronous>, transform_indices = @transform_5, window_bounds = array<i64: 16, 128>}, {pipeline_mode = #tpu.pipeline_mode<synchronous>, transform_indices = @transform_6, window_bounds = array<i64: 1, 128>}, {transform_indices = @transform_7, window_bounds = array<i64: 32, 128>}]} {
    %c0 = arith.constant 0 : index
    %c0_0 = arith.constant 0 : index
    %0 = vector.load %arg1[%c0, %c0_0] : memref<32x32xf32, #tpu.memory_space<vmem>>, vector<32x32xf32>
    %1 = arith.truncf %0 : vector<32x32xf32> to vector<32x32xbf16>
    %c0_1 = arith.constant 0 : index
    %c0_2 = arith.constant 0 : index
    %2 = vector.load %arg2[%c0_1, %c0_2] : memref<32x32xbf16, #tpu.memory_space<vmem>>, vector<32x32xbf16>
    %cst = arith.constant dense<0.000000e+00> : vector<32x32xf32>
    %3 = tpu.matmul %1, %2, %cst {dimension_numbers = #tpu.dot_dimension_numbers<[1], [0], [0], [1], [0, 0, 1, 1], [], []>} : vector<32x32xbf16>, vector<32x32xbf16>, vector<32x32xf32> -> vector<32x32xf32>
    %c0_3 = arith.constant 0 : index
    %c0_4 = arith.constant 0 : index
    %4 = vector.load %arg3[%c0_3, %c0_4] : memref<1x32xf32, #tpu.memory_space<vmem>>, vector<1x32xf32>
    %5 = vector.broadcast %4 : vector<1x32xf32> to vector<32x32xf32>
    %6 = arith.addf %3, %5 : vector<32x32xf32>
    %cst_5 = arith.constant 0.000000e+00 : f32
    %7 = vector.broadcast %cst_5 : f32 to vector<32x32xf32>
    %8 = arith.maximumf %6, %7 : vector<32x32xf32>
    %9 = arith.truncf %8 : vector<32x32xf32> to vector<32x32xbf16>
    %c0_6 = arith.constant 0 : index
    %c0_7 = arith.constant 0 : index
    %10 = vector.load %arg4[%c0_6, %c0_7] : memref<32x16xbf16, #tpu.memory_space<vmem>>, vector<32x16xbf16>
    %cst_8 = arith.constant dense<0.000000e+00> : vector<32x16xf32>
    %11 = tpu.matmul %9, %10, %cst_8 {dimension_numbers = #tpu.dot_dimension_numbers<[1], [0], [0], [1], [0, 0, 1, 1], [], []>} : vector<32x32xbf16>, vector<32x16xbf16>, vector<32x16xf32> -> vector<32x16xf32>
    %c0_9 = arith.constant 0 : index
    %c0_10 = arith.constant 0 : index
    %12 = vector.load %arg5[%c0_9, %c0_10] : memref<1x16xf32, #tpu.memory_space<vmem>>, vector<1x16xf32>
    %13 = vector.broadcast %12 : vector<1x16xf32> to vector<32x16xf32>
    %14 = arith.addf %11, %13 : vector<32x16xf32>
    %cst_11 = arith.constant 0.000000e+00 : f32
    %15 = vector.broadcast %cst_11 : f32 to vector<32x16xf32>
    %16 = arith.maximumf %14, %15 : vector<32x16xf32>
    %17 = arith.truncf %16 : vector<32x16xf32> to vector<32x16xbf16>
    %c0_12 = arith.constant 0 : index
    %c0_13 = arith.constant 0 : index
    %18 = vector.load %arg6[%c0_12, %c0_13] : memref<16x128xbf16, #tpu.memory_space<vmem>>, vector<16x128xbf16>
    %cst_14 = arith.constant dense<0.000000e+00> : vector<32x128xf32>
    %19 = tpu.matmul %17, %18, %cst_14 {dimension_numbers = #tpu.dot_dimension_numbers<[1], [0], [0], [1], [0, 0, 1, 1], [], []>} : vector<32x16xbf16>, vector<16x128xbf16>, vector<32x128xf32> -> vector<32x128xf32>
    %c0_15 = arith.constant 0 : index
    %c0_16 = arith.constant 0 : index
    %20 = vector.load %arg7[%c0_15, %c0_16] : memref<1x128xf32, #tpu.memory_space<vmem>>, vector<1x128xf32>
    %21 = vector.broadcast %20 : vector<1x128xf32> to vector<32x128xf32>
    %22 = arith.addf %19, %21 : vector<32x128xf32>
    %23 = arith.negf %22 : vector<32x128xf32>
    %24 = math.exp %23 : vector<32x128xf32>
    %cst_17 = arith.constant 1.000000e+00 : f32
    %25 = vector.broadcast %cst_17 : f32 to vector<32x128xf32>
    %26 = arith.addf %25, %24 : vector<32x128xf32>
    %27 = arith.divf %25, %26 : vector<32x128xf32>
    %28 = arith.truncf %27 : vector<32x128xf32> to vector<32x128xbf16>
    %c0_18 = arith.constant 0 : index
    %c0_19 = arith.constant 0 : index
    %29 = vector.load %arg8[%c0_18, %c0_19] : memref<32x128xbf16, #tpu.memory_space<vmem>>, vector<32x128xbf16>
    tpu.vector_store %arg8[%c0_18, %c0_19], %28 {strides = array<i32>} : memref<32x128xbf16, #tpu.memory_space<vmem>>, vector<32x128xbf16>,
    return
  }
  func.func @transform_0(%arg0: i32) -> (i32, i32) {
    %c0_i32 = arith.constant 0 : i32
    %c0_i32_0 = arith.constant 0 : i32
    return %arg0, %c0_i32 : i32, i32
  }
  func.func @transform_1(%arg0: i32) -> (i32, i32) {
    %c0_i32 = arith.constant 0 : i32
    %c0_i32_0 = arith.constant 0 : i32
    %c0_i32_1 = arith.constant 0 : i32
    return %c0_i32, %c0_i32_0 : i32, i32
  }
  func.func @transform_2(%arg0: i32) -> (i32, i32) {
    %c0_i32 = arith.constant 0 : i32
    %c0_i32_0 = arith.constant 0 : i32
    %c0_i32_1 = arith.constant 0 : i32
    return %c0_i32, %c0_i32_0 : i32, i32
  }
  func.func @transform_3(%arg0: i32) -> (i32, i32) {
    %c0_i32 = arith.constant 0 : i32
    %c0_i32_0 = arith.constant 0 : i32
    %c0_i32_1 = arith.constant 0 : i32
    return %c0_i32, %c0_i32_0 : i32, i32
  }
  func.func @transform_4(%arg0: i32) -> (i32, i32) {
    %c0_i32 = arith.constant 0 : i32
    %c0_i32_0 = arith.constant 0 : i32
    %c0_i32_1 = arith.constant 0 : i32
    return %c0_i32, %c0_i32_0 : i32, i32
  }
  func.func @transform_5(%arg0: i32) -> (i32, i32) {
    %c0_i32 = arith.constant 0 : i32
    %c0_i32_0 = arith.constant 0 : i32
    %c0_i32_1 = arith.constant 0 : i32
    return %c0_i32, %c0_i32_0 : i32, i32
  }
  func.func @transform_6(%arg0: i32) -> (i32, i32) {
    %c0_i32 = arith.constant 0 : i32
    %c0_i32_0 = arith.constant 0 : i32
    %c0_i32_1 = arith.constant 0 : i32
    return %c0_i32, %c0_i32_0 : i32, i32
  }
  func.func @transform_7(%arg0: i32) -> (i32, i32) {
    %c0_i32 = arith.constant 0 : i32
    %c0_i32_0 = arith.constant 0 : i32
    return %arg0, %c0_i32 : i32, i32
  }
}

</mosaic_0001>

<bundles_post_ra>
// kernel: tpu_custom_call.1
= control target key start
LH: loop header
LB: loop body
LE: loop exit
PB: predicated region body
PF: predicated region fallthrough
CT: control target
= control target key end

     0   :  { %12 = vsyncpa [#allocation3], 0  ;;  %s1081_s0 = inlined_call_operand.vmem [shape: f32[50,32], index: 0, kind: input, shape index: {}]   ;;  %s1082_s1 = inlined_call_operand.vmem [shape: bf16[32,32], index: 1, kind: input, shape index: {}]   ;;  %s1083_s2 = inlined_call_operand.vmem [shape: f32[1,32], index: 2, kind: input, shape index: {}]   ;;  %s1084_s3 = inlined_call_operand.vmem [shape: bf16[32,16], index: 3, kind: input, shape index: {}]   ;;  %s1085_s4 = inlined_call_operand.vmem [shape: f32[1,16], index: 4, kind: input, shape index: {}]   ;;  %s1086_s5 = inlined_call_operand.vmem [shape: bf16[16,128], index: 5, kind: input, shape index: {}]   ;;  %s1087_s6 = inlined_call_operand.vmem [shape: f32[1,128], index: 6, kind: input, shape index: {}]   ;;  %s1088_s7 = inlined_call_operand.hbm [shape: bf16[50,128], index: 7, kind: output, shape index: {}]  }
   0x1   :  { %14 = vsyncpa [#allocation3 + $0x1], 0  ;;  %s932_s24 = smov 0   ;;  %s934_s25 = smov 0  }
   0x2   :  { %s936_s26 = smov 0   ;;  %s938_s27 = smov 0  }
   0x3 LB: > { %s953_s28 = sadd.s32 4294967295, %s887_s27   ;;  %s677_s29 = sadd.s32 4294967294, %s887_s27   ;;  %s887_s27 = sphi %s938_s27, %s1094_s27   ;;  %s883_s26 = sphi %s936_s26, %s1093_s26   ;;  %s879_s25 = sphi %s934_s25, %s1092_s25   ;;  %s875_s24 = sphi %s932_s24, %s1091_s24  }
   0x4   : > { %s957_s30 = sadd.s32 1, %s887_s27   ;;  %s179_s8 = sadd.s32 1, %s883_s26 }
   0x5   : > { %s176_s9 = ssub.s32 %s887_s27, %s957_s30  ;;  %p189_p0 = scmp.ne.s32.totalorder %s883_s26, %s879_s25 }
   0x6   : > { %p177_p1 = scmp.eq.s32.totalorder %s176_s9, 0  ;;  %p190_p2 = scmp.eq.s32.totalorder %s953_s28, 1 }
   0x7   : > { %p195_p3 = scmp.ne.s32.totalorder %s879_s25, %s875_s24  ;;  %p196_p4 = scmp.eq.s32.totalorder %s677_s29, 1 }
   0x8   : > { %s968_s10 = scalar_select %p177_p1, %s883_s26, %s179_s8  }
   0x9   : > { %p970_p5 = por %p190_p2, %p189_p0  ;;  %p974_p6 = por %p196_p4, %p195_p3 }
   0xa   : > { %p680_p7 = scmp.ge.s32.totalorder %s887_s27, 1  ;;  %p249_p8 = scmp.lt.s32.totalorder %s887_s27, 3 }
   0xc   : > { %p250_p9 = pnand %p680_p7, %p249_p8 }
   0xd   : > { %v804_v0 = vld [vmem:[%s1082_s1] sm:$0xff] (!%p250_p9)   ;;  %s984_s15 = sshll.u32 (!%p250_p9), %s953_s28, 2  ;;  %v805_v1 = vld [vmem:[%s1082_s1 + $0x8] sm:$0xff] (!%p250_p9)   ;;  %vm334_vm0 = vcmask (!%p250_p9), 261120   ;;  %vm495_vm1 = vcmask (!%p250_p9), 130048   ;;  %s282_s20 = sand.u32 (!%p250_p9), 1, %s879_s25  }
   0xe   : > { %253 = sbr.rel (%p250_p9) target bundleno = 747 (0x2eb), region = 48  ;;  %p290_p10 = scmp.lt.s32.totalorder (!%p250_p9), %s984_s15, 6  ;;  %742 = vmatprep.subr.bf16.mxu0 (!%p250_p9), %v804_v0  ;;  %v806_v8 = vld [vmem:[%s1084_s3] sm:$0xff] (!%p250_p9)   ;;  %v807_v9 = vld [vmem:[%s1084_s3 + $0x8] sm:$0xff] (!%p250_p9)  }
   0xf   : > { %743 = vmatpush3.bf16.msra.mxu0 (!%p250_p9), %v804_v0  ;;  %750 = vmatprep.subr.bf16.mxu1 (!%p250_p9), %v806_v8  ;;  %v684_v10 = vld [vmem:[%s1083_s2] ss:$0 sm:$0xff] (!%p250_p9)  ;;  %s681_s23 = sshll.u32 (!%p250_p9), %s282_s20, 4  ;;  %s1021_s8 = scalar_lea.sflag (!%p250_p9), [#allocation3], %s282_s20 }
  0x10   : > { %744 = vmatprep.subr.bf16.mxu0 (!%p250_p9), %v805_v1  ;;  %751 = vmatpush3.bf16.msra.mxu1 (!%p250_p9), %v806_v8  ;;  %v808_v25 = vld [vmem:[%s1086_s5] sm:$0xff] (!%p250_p9)   ;;  %s284_s29 = scalar_lea.vmem (!%p250_p9), [#allocation2], %s681_s23 }
  0x11   : > { %752 = vmatprep.subr.bf16.mxu1 (!%p250_p9), %v807_v9  ;;  %v689_v26 = vld [vmem:[%s1085_s4] ss:$0 sm:$0xff] (!%p250_p9) }
  0x12   : > { %v694_v41 = vld [vmem:[%s1087_s6] ss:$0 sm:$0xff] (!%p250_p9) }
  0x13   : > { %745 = vmatpush3.bf16.msra.mxu0 (!%p250_p9), %v805_v1 }
  0x14   : > { %753 = vmatpush3.bf16.msra.mxu1 (!%p250_p9), %v807_v9  ;;  %758 = vmatprep.subr.bf16.mxu0 (!%p250_p9), %v808_v25 }
  0x15   : > { %s291_s18 = scalar_select %p290_p10, %s984_s15, 6 }
  0x16   : > { %s604_s9 = ssub.s32 (%p970_p5), 7, %s984_s15 }
  0x17   : > { %s683_s19 = sshll.u32 %s291_s18, 3  ;;  %p605_p11 = scmp.lt.s32.totalorder (%p970_p5), %s604_s9, 4 }
  0x18   : > { %s293_s22 = scalar_lea.vmem %s1081_s0, %s683_s19 }
  0x19   : > { %v305_v2 = vld [vmem:[%s293_s22] sm:$0xff]  ;;  %v306_v3 = vld [vmem:[%s293_s22 + $0x8] sm:$0xff]  ;;  %v307_v4 = vld [vmem:[%s293_s22 + $0x10] sm:$0xff] }
  0x1a   : > { %v309_v5 = vpack.c.bf16 %v306_v3, %v305_v2  ;;  %v308_v6 = vld [vmem:[%s293_s22 + $0x18] sm:$0xff] }
  0x1b   : > { %v310_v7 = vpack.c.bf16 %v308_v6, %v307_v4 }
  0x1c   : > { %746 = vmatprep.mubr.msk.bf16.mxu0 %vm334_vm0, %v309_v5 }
  0x1d   : > { %747 = vmatmul.mubr.msk.bf16.vlgmr.msra.gmra.mrb[0].mxu0 %vm334_vm0, %v310_v7 }
  0x1e   : > { %759 = vmatpush3.bf16.msra.mxu0 %v808_v25 }
  0xf0   : > { %v748_v11 = vpop.f32.mrb[0].mxu0 }
  0xf1   : > { %v384_v12 = vadd.f32 %v748_v11, %v684_v10  ;;  %v375_v13 = vpop.f32.mrb[1].mxu0 }
  0xf2   : > { %v376_v14 = vadd.f32 %v684_v10, %v375_v13  ;;  %v749_v15 = vpop.f32.mrb[2].mxu0 }
  0xf3   : > { %v387_v16 = vadd.f32 %v749_v15, %v684_v10  ;;  %v378_v17 = vpop.f32.mrb[3].mxu0  ;;  %v392_v19 = vmax.f32 %v384_v12, 0.0 }
  0xf4   : > { %v379_v18 = vadd.f32 %v684_v10, %v378_v17  ;;  %v390_v21 = vmax.f32 %v376_v14, 0.0 }
  0xf5   : > { %v393_v20 = vmax.f32 %v387_v16, 0.0 }
  0xf6   : > { %v391_v22 = vmax.f32 %v379_v18, 0.0 }
  0xf7   : > { %v395_v23 = vpack.c.bf16 %v393_v20, %v392_v19 }
  0xf8   : > { %v394_v24 = vpack.c.bf16 %v391_v22, %v390_v21 }
  0xfa   : > { %754 = vmatprep.mubr.msk.bf16.mxu1 %vm334_vm0, %v394_v24 }
  0xfb   : > { %755 = vmatmul.mubr.msk.bf16.vlgmr.msra.gmra.mrb[0].mxu1 %vm334_vm0, %v395_v23 }
 0x1ce   : > { %v756_v27 = vpop.f32.mrb[0].mxu1 }
 0x1cf   : > { %v468_v28 = vadd.f32 %v756_v27, %v689_v26  ;;  %v459_v29 = vpop.f32.mrb[1].mxu1 }
 0x1d0   : > { %v460_v30 = vadd.f32 %v689_v26, %v459_v29  ;;  %v757_v31 = vpop.f32.mrb[2].mxu1 }
 0x1d1   : > { %v471_v32 = vadd.f32 %v757_v31, %v689_v26  ;;  %v462_v33 = vpop.f32.mrb[3].mxu1  ;;  %v476_v35 = vmax.f32 %v468_v28, 0.0 }
 0x1d2   : > { %v463_v34 = vadd.f32 %v689_v26, %v462_v33  ;;  %v474_v37 = vmax.f32 %v460_v30, 0.0 }
 0x1d3   : > { %v477_v36 = vmax.f32 %v471_v32, 0.0 }
 0x1d4   : > { %v475_v38 = vmax.f32 %v463_v34, 0.0 }
 0x1d5   : > { %v479_v39 = vpack.c.bf16 %v477_v36, %v476_v35 }
 0x1d6   : > { %v478_v40 = vpack.c.bf16 %v475_v38, %v474_v37 }
 0x1d8   : > { %760 = vmatprep.mubr.msk.bf16.mxu0 %vm495_vm1, %v478_v40 }
 0x1d9   : > { %761 = vmatmul.mubr.msk.bf16.vlgmr.msra.gmra.mrb[4].mxu0 %vm495_vm1, %v479_v39 }
 0x2ac   : > { %v762_v42 = vpop.f32.mrb[4].mxu0 }
 0x2ad   : > { %v545_v43 = vadd.f32 %v762_v42, %v694_v41  ;;  %v536_v44 = vpop.f32.mrb[5].mxu0 }
 0x2ae   : > { %v537_v45 = vadd.f32 %v694_v41, %v536_v44  ;;  %v763_v46 = vpop.f32.mrb[6].mxu0 }
 0x2af   : > { %v700_v47 = vmul.f32 -1.442695, %v545_v43  ;;  %v548_v48 = vadd.f32 %v763_v46, %v694_v41  ;;  %v539_v49 = vpop.f32.mrb[7].mxu0 }
 0x2b0   : > { %v698_v50 = vmul.f32 -1.442695, %v537_v45  ;;  %v540_v51 = vadd.f32 %v694_v41, %v539_v49 }
 0x2b1   : > { %809 = vpow2.f32 %v700_v47  ;;  %v701_v52 = vmul.f32 -1.442695, %v548_v48 }
 0x2b2   : > { %811 = vpow2.f32 %v698_v50  ;;  %v699_v53 = vmul.f32 -1.442695, %v540_v51 }
 0x2b3   : > { %813 = vpow2.f32 %v701_v52 }
 0x2b4   : > { %815 = vpow2.f32 %v699_v53 }
 0x2bb   : > { %v810_v54 = vpop.eup %809 }
 0x2bc   : > { %v812_v55 = vpop.eup %811  ;;  %v565_v56 = vadd.f32 1.0, %v810_v54 }
 0x2bd   : > { %v814_v57 = vpop.eup %813  ;;  %v563_v58 = vadd.f32 1.0, %v812_v55 }
 0x2be   : > { %v816_v59 = vpop.eup %815  ;;  %817 = vrcp.f32 %v565_v56  ;;  %v566_v60 = vadd.f32 1.0, %v814_v57 }
 0x2bf   : > { %819 = vrcp.f32 %v563_v58  ;;  %v564_v61 = vadd.f32 1.0, %v816_v59 }
 0x2c0   : > { %821 = vrcp.f32 %v566_v60 }
 0x2c1   : > { %823 = vrcp.f32 %v564_v61 }
 0x2c8   : > { %v818_v62 = vpop.eup %817  ;;  %602 = sbr.rel (!%p970_p5) target bundleno = 747 (0x2eb), region = 52 }
 0x2c9   : > { %v820_v63 = vpop.eup %819 }
 0x2ca   : > { %v822_v0 = vpop.eup %821 }
 0x2cb   : > { %v824_v1 = vpop.eup %823  ;;  %v728_v2 = vpack.c.bf16 %v822_v0, %v818_v62 }
 0x2cc   : > { %v723_v3 = vpack.c.bf16 %v824_v1, %v820_v63 }
 0x2cd   : > { %730 = vst [vmem:[%s284_s29 + $0x8] sm:$0xff] %v728_v2  }
 0x2ce   : > { %724 = vst [vmem:[%s284_s29] sm:$0xff] %v723_v3  }
 0x2cf   : > { %s1096_s9 = smov (!%p605_p11, %s604_s9), 4 }
 0x2d0   : > { %s1026_s13 = sshll.u32 %s1096_s9, 6 }
 0x2d1   : > { %s609_s14 = ssub.s32 256, %s1026_s13 }
 0x2d2   : > { %610 = vsyncadd %s1021_s8, %s609_s14  ;;  %p709_p12 = scmp.ne.s32.totalorder %s1026_s13, 0  ;;  %s719_s16 = sshll.u32 %s953_s28, 8 }
 0x2d3   : > { %s1035_s11 = scalar_lea.hbm %s1088_s7, %s719_s16  ;;  %s615_s19 = sshll.u32 %s284_s29, 4  ;;  %s1037_s19 = int_to_ptr.vmem [resolvable:$true] %s615_s19 }
 0x2d4   : > { %s825_s15 = scalar_lea.vmem %s1037_s19, %s1026_s13  ;;  %s889_s20 = smov [#allocation2]  }
 0x2d5   : > { %p826_p13 = scmp.ne.s32.totalorder %s1037_s19, %s825_s15  ;;  %s829_s21 = sshll.u32 %s889_s20, 4  ;;  %s830_s21 = int_to_ptr.vmem [resolvable:$false] %s829_s21 }
 0x2d6   : > { %s831_s28 = scalar_lea.vmem %s830_s21, 512  ;;  %p832_p2 = scmp.lt.s32.totalorder %s1037_s19, %s830_s21 }
 0x2d7   : > { %p827_p0 = pnand %p826_p13, %p709_p12  ;;  %p833_p3 = scmp.lt.s32.totalorder %s831_s28, %s825_s15 }
 0x2d9   : > { %p828_p1 = pneg %p827_p0  ;;  %p834_p4 = por %p833_p3, %p832_p2 }
 0x2db   : > { %p835_p5 = pnand %p834_p4, %p828_p1 }
 0x2dd   : > { %838 = shalt.err (!%p835_p5)
}
 0x2de   : > { %s839_s22 = scalar_lea.hbm %s1035_s11, %s1026_s13  ;;  %s843_s9 = scalar_lea.hbm %s1088_s7, 448 }
 0x2df   : > { %p840_p7 = scmp.ne.s32.totalorder %s1035_s11, %s839_s22  ;;  %p844_p10 = scmp.lt.u32.totalorder %s1035_s11, %s1088_s7 }
 0x2e0   : > { %p845_p11 = scmp.lt.u32.totalorder %s843_s9, %s839_s22  ;;  %p847_p0 = scmp.lt.u32.totalorder %s839_s22, %s1035_s11 }
 0x2e1   : > { %p841_p8 = pnand %p840_p7, %p709_p12 }
 0x2e2   : > { %p846_p13 = por %p845_p11, %p844_p10 }
 0x2e3   : > { %p842_p9 = pneg %p841_p8 }
 0x2e4   : > { %p848_p1 = por %p847_p0, %p846_p13 }
 0x2e6   : > { %p849_p2 = pnand %p848_p1, %p842_p9 }
 0x2e8   : > { %852 = shalt.err (!%p849_p2)
}
 0x2e9   : > { %s890_s17 = smov 64   ;;  %s891_s18 = smov 4  }
 0x2ea   : > { %621 = dma.vmem_to_hbm [thread:$0]  (%p709_p12), %s1037_s19, %s1026_s13, %s1035_s11, %s1021_s8, %s890_s17, %s890_s17, %s891_s18  }
 0x2eb PF: > { %p769_p3 = scmp.ge.s32.totalorder %s887_s27, 2  ;;  %s630_s15 = sand.u32 1, %s875_s24  }
 0x2ec   : > { %s631_s20 = scalar_lea.sflag [#allocation3], %s630_s15 }
 0x2ed   : > { %p766_p4 = pnand %p769_p3, %p974_p6 }
 0x2ef   : > { %870 = dma.done.wait (!%p766_p4), %s631_s20, 256  }
 0x2f0   : > { %872 = vsyncadd (!%p766_p4), %s631_s20, 4294967040  ;;  %p17_p5 = scmp.ge.s32.totalorder %s957_s30, 4   ;;  %s1091_s24 = smov %s879_s25 }
 0x2f1   : > { %s1092_s25 = smov %s883_s26  ;;  %s1093_s26 = smov %s968_s10 }
 0x2f2   : > { %s1094_s27 = smov %s957_s30  ;;  %19 = sbr.rel (!%p17_p5) target bundleno = 3 (0x3), region = 83 }
 0x2f9   :  { %636 = vsyncpa [#allocation3], 1 }
 0x2fa   :  { %638 = vsyncpa [#allocation3 + $0x1], 1 }

</bundles_post_ra>
